<compile_context>
chip_gen: v6e
topology: v6e:2x2x1
jax: 0.10.0
libtpu: 0.0.40
codegen_flags: <defaults>
</compile_context>

<pallas_src>
import functools
import math

import numpy as np
import jax
import jax.numpy as jnp
from jax.experimental import pallas as pl
from jax.experimental.pallas import tpu as pltpu


def _round_up(x, m):
    return ((x + m - 1) // m) * m


@functools.lru_cache(maxsize=None)
def _tpu_cfg():
    """Per-generation tiling / VMEM settings (conservative when unknown)."""
    try:
        kind = jax.devices()[0].device_kind.lower()
    except Exception:
        kind = ""
    if ("v5" in kind) or ("v6" in kind):            # 128 MiB VMEM generations
        return dict(vmem_limit=96 * 1024 * 1024,
                    mm_budget=48 * 1024 * 1024,
                    ew_budget=24 * 1024 * 1024,
                    tm_cap=1024)
    # v7x (64 MiB VMEM) or unknown backend -> conservative settings.
    return dict(vmem_limit=32 * 1024 * 1024,
                mm_budget=20 * 1024 * 1024,
                ew_budget=12 * 1024 * 1024,
                tm_cap=512)


def _pick_div_tile(m, per_row_bytes, cap, budget):
    """Largest row tile that divides round_up(m, 8), is a multiple of 8,
    <= cap and fits the byte budget (avoids padding/slicing big tensors)."""
    mp = _round_up(max(int(m), 1), 8)
    hi = min(cap, mp)
    hi -= hi % 8
    for t in range(hi, 7, -8):
        if mp % t == 0 and t * max(int(per_row_bytes), 1) <= budget:
            return t, mp
    return 8, mp


def _pick_tm(M, Kg, tn, cfg):
    fixed = 2 * Kg * tn * 2 + 8 * tn * 4        # weights (double-buffered) + scale/bias/pool
    per_row = 2 * Kg * 2 + 2 * tn * 4           # x (bf16) + output (<=f32), double-buffered
    budget = max(cfg["mm_budget"] - fixed, 1 * 1024 * 1024)
    return _pick_div_tile(M, per_row, cfg["tm_cap"], budget)


# --------------------------------------------------------------------------
# Pallas kernels
# --------------------------------------------------------------------------

def _conv_matmul_kernel(x_ref, w_ref, s_ref, b_ref, o_ref, *, act):
    # x: (1, TM, K) bf16, w: (1, K, TN) bf16, s/b: (1, TN) f32, o: (TM, TN)
    acc = jnp.dot(x_ref[0], w_ref[0], preferred_element_type=jnp.float32)
    y = acc * s_ref[...] + b_ref[...]
    if act == "relu":
        y = jnp.maximum(y, 0.0)
    o_ref[...] = y.astype(o_ref.dtype)


def _conv_matmul_pool_kernel(x_ref, w_ref, s_ref, b_ref, o_ref, p_ref, *,
                             act, nbatch, hw, tm):
    # Same as above plus a fused per-batch global-average-pool accumulator:
    # p_ref block (B, TN) is m-invariant (revisited along the "arbitrary" m axis).
    m = pl.program_id(2)
    acc = jnp.dot(x_ref[0], w_ref[0], preferred_element_type=jnp.float32)
    y = acc * s_ref[...] + b_ref[...]
    if act == "relu":
        y = jnp.maximum(y, 0.0)
    o_ref[...] = y.astype(o_ref.dtype)

    @pl.when(m == 0)
    def _():
        p_ref[...] = jnp.zeros_like(p_ref)

    rows = m * tm + jax.lax.broadcasted_iota(jnp.int32, (tm, 1), 0)
    parts = []
    for b in range(nbatch):
        msk = (rows >= b * hw) & (rows < (b + 1) * hw)   # also masks padded tail rows
        parts.append(jnp.sum(jnp.where(msk, y, 0.0), axis=0, keepdims=True))
    p_ref[...] += jnp.concatenate(parts, axis=0)

    @pl.when(m == pl.num_programs(2) - 1)
    def _():
        p_ref[...] = p_ref[...] * (1.0 / hw)


def _gap_kernel(x_ref, o_ref, *, inv_n):
    @pl.when(pl.program_id(0) == 0)
    def _():
        o_ref[...] = jnp.zeros_like(o_ref)
    o_ref[...] += jnp.sum(x_ref[...].astype(jnp.float32), axis=1)

    @pl.when(pl.program_id(0) == pl.num_programs(0) - 1)
    def _():
        o_ref[...] = o_ref[...] * inv_n


def _se_mlp_kernel(p_ref, w1_ref, b1_ref, w2_ref, b2_ref, o_ref):
    h = jnp.dot(p_ref[...], w1_ref[...], preferred_element_type=jnp.float32)
    h = jnp.maximum(h + b1_ref[...], 0.0)
    s = jnp.dot(h.astype(w2_ref.dtype), w2_ref[...],
                preferred_element_type=jnp.float32) + b2_ref[...]
    o_ref[...] = jax.nn.sigmoid(s)


def _se_res_kernel(x_ref, s_ref, r_ref, o_ref):
    y = x_ref[...].astype(jnp.float32) * s_ref[...] + r_ref[...].astype(jnp.float32)
    o_ref[...] = jnp.maximum(y, 0.0).astype(o_ref.dtype)


# --------------------------------------------------------------------------
# Pallas call wrappers
# --------------------------------------------------------------------------

def _conv_matmul(patches, w, scale, bias, *, act, out_dtype=jnp.bfloat16,
                 pool_hw=None, pool_batch=None):
    """patches: (G, M, Kg), w: (G, Kg, Ng), scale/bias: (G*Ng,).
    Returns (M, G*Ng) out_dtype and, if pool_hw is given, a fused per-batch
    global average pool (B, G*Ng) f32 of the pre-activation output."""
    G, M, Kg = patches.shape
    Ng = w.shape[2]
    N = G * Ng
    cfg = _tpu_cfg()

    tn = Ng if Ng <= 512 else 512
    assert Ng % tn == 0
    Nt = Ng // tn
    tm, Mp = _pick_tm(M, Kg, tn, cfg)

    x = patches.astype(jnp.bfloat16)
    if Mp != M:
        x = jnp.pad(x, ((0, 0), (0, Mp - M), (0, 0)))
    w = w.astype(jnp.bfloat16)
    s = scale.reshape(1, N).astype(jnp.float32)
    b = bias.reshape(1, N).astype(jnp.float32)

    in_specs = [
        pl.BlockSpec((1, tm, Kg), lambda g, n, m: (g, m, 0)),
        pl.BlockSpec((1, Kg, tn), lambda g, n, m: (g, 0, n)),
        pl.BlockSpec((1, tn), lambda g, n, m: (0, g * Nt + n)),
        pl.BlockSpec((1, tn), lambda g, n, m: (0, g * Nt + n)),
    ]
    out_bytes = jnp.dtype(out_dtype).itemsize
    cost = pl.CostEstimate(
        flops=2 * G * Mp * Kg * Ng,
        transcendentals=0,
        bytes_accessed=x.size * 2 + w.size * 2 + Mp * N * out_bytes + 2 * N * 4)

    if pool_hw is None:
        out = pl.pallas_call(
            functools.partial(_conv_matmul_kernel, act=act),
            out_shape=jax.ShapeDtypeStruct((Mp, N), out_dtype),
            grid=(G, Nt, Mp // tm),          # m innermost: weights VMEM-resident
            in_specs=in_specs,
            out_specs=pl.BlockSpec((tm, tn), lambda g, n, m: (m, g * Nt + n)),
            compiler_params=pltpu.CompilerParams(
                dimension_semantics=("parallel", "parallel", "parallel"),
                vmem_limit_bytes=cfg["vmem_limit"]),
            cost_estimate=cost,
        )(x, w, s, b)
        return out[:M] if Mp != M else out

    assert G == 1, "fused global-average-pool only used for dense 1x1 convs"
    B = pool_batch
    out, pooled = pl.pallas_call(
        functools.partial(_conv_matmul_pool_kernel, act=act,
                          nbatch=B, hw=pool_hw, tm=tm),
        out_shape=(jax.ShapeDtypeStruct((Mp, N), out_dtype),
                   jax.ShapeDtypeStruct((B, N), jnp.float32)),
        grid=(G, Nt, Mp // tm),
        in_specs=in_specs,
        out_specs=(pl.BlockSpec((tm, tn), lambda g, n, m: (m, g * Nt + n)),
                   pl.BlockSpec((B, tn), lambda g, n, m: (0, g * Nt + n))),
        compiler_params=pltpu.CompilerParams(
            dimension_semantics=("arbitrary", "parallel", "arbitrary"),
            vmem_limit_bytes=cfg["vmem_limit"]),
        cost_estimate=cost,
    )(x, w, s, b)
    if Mp != M:
        out = out[:M]
    return out, pooled


@jax.jit
def global_avg_pool(x):
    """x: (B, HW, C) bf16/f32 -> (B, C) f32  (AdaptiveAvgPool2d(1))."""
    B, HW, C = x.shape
    cfg = _tpu_cfg()
    per_row = 2 * B * C * x.dtype.itemsize
    thw, HWp = _pick_div_tile(HW, per_row, cfg["tm_cap"], cfg["ew_budget"])
    if HWp != HW:
        x = jnp.pad(x, ((0, 0), (0, HWp - HW), (0, 0)))     # zero pad: no effect on sum
    return pl.pallas_call(
        functools.partial(_gap_kernel, inv_n=float(1.0 / HW)),
        out_shape=jax.ShapeDtypeStruct((B, C), jnp.float32),
        grid=(HWp // thw,),
        in_specs=[pl.BlockSpec((B, thw, C), lambda t: (0, t, 0))],
        out_specs=pl.BlockSpec((B, C), lambda t: (0, 0)),
        compiler_params=pltpu.CompilerParams(
            dimension_semantics=("arbitrary",),
            vmem_limit_bytes=cfg["vmem_limit"]),
    )(x)


@jax.jit
def se_gate(pooled, w1, b1, w2, b2):
    """sigmoid(fc2(relu(fc1(pooled)))) fused in one kernel; pooled: (B, C) f32."""
    B, C = pooled.shape
    Cr = w1.shape[1]
    cfg = _tpu_cfg()
    return pl.pallas_call(
        _se_mlp_kernel,
        out_shape=jax.ShapeDtypeStruct((B, C), jnp.float32),
        grid=(1,),
        in_specs=[
            pl.BlockSpec((B, C), lambda i: (0, 0)),
            pl.BlockSpec((C, Cr), lambda i: (0, 0)),
            pl.BlockSpec((1, Cr), lambda i: (0, 0)),
            pl.BlockSpec((Cr, C), lambda i: (0, 0)),
            pl.BlockSpec((1, C), lambda i: (0, 0)),
        ],
        out_specs=pl.BlockSpec((B, C), lambda i: (0, 0)),
        compiler_params=pltpu.CompilerParams(
            dimension_semantics=("arbitrary",),
            vmem_limit_bytes=cfg["vmem_limit"]),
    )(pooled.astype(jnp.bfloat16), w1, b1, w2, b2)


@jax.jit
def se_scale_add_relu(x, s, r):
    """relu(x * s + r); x, r: (B, HW, C) bf16, s: (B, C) f32 -> bf16."""
    B, HW, C = x.shape
    cfg = _tpu_cfg()
    per_row = 2 * C * (x.dtype.itemsize + r.dtype.itemsize + 2)
    thw, HWp = _pick_div_tile(HW, per_row, cfg["tm_cap"], cfg["ew_budget"])
    if HWp != HW:
        pad = ((0, 0), (0, HWp - HW), (0, 0))
        x = jnp.pad(x, pad)
        r = jnp.pad(r, pad)
    out = pl.pallas_call(
        _se_res_kernel,
        out_shape=jax.ShapeDtypeStruct((B, HWp, C), jnp.bfloat16),
        grid=(B, HWp // thw),
        in_specs=[
            pl.BlockSpec((1, thw, C), lambda b, t: (b, t, 0)),
            pl.BlockSpec((1, 1, C), lambda b, t: (b, 0, 0)),
            pl.BlockSpec((1, thw, C), lambda b, t: (b, t, 0)),
        ],
        out_specs=pl.BlockSpec((1, thw, C), lambda b, t: (b, t, 0)),
        compiler_params=pltpu.CompilerParams(
            dimension_semantics=("parallel", "parallel"),
            vmem_limit_bytes=cfg["vmem_limit"]),
    )(x, s.reshape(B, 1, C), r)
    return out[:, :HW] if HWp != HW else out


@jax.jit
def maxpool_3x3_s2_ceil(x):
    """nn.MaxPool2d(3, stride=2, ceil_mode=True) on NHWC.

    Fused jnp.maximum fold over the 9 strided slices: XLA fuses the slices
    into one elementwise pass, no (9, M, C) HBM stack is materialized."""
    # TODO(synk): PyTorch's ceil_mode drops windows starting entirely in padding;
    # no such window occurs for the spatial sizes this network produces.
    B, H, W, C = x.shape
    Ho = int(math.ceil((H - 3) / 2)) + 1
    Wo = int(math.ceil((W - 3) / 2)) + 1
    ph = max(0, (Ho - 1) * 2 + 3 - H)
    pw = max(0, (Wo - 1) * 2 + 3 - W)
    xp = jnp.pad(x, ((0, 0), (0, ph), (0, pw), (0, 0)),
                 constant_values=-jnp.inf)
    out = None
    for dh in range(3):
        for dw in range(3):
            sl = xp[:, dh:dh + 2 * (Ho - 1) + 1:2, dw:dw + 2 * (Wo - 1) + 1:2, :]
            out = sl if out is None else jnp.maximum(out, sl)
    return out


# --------------------------------------------------------------------------
# Plain-JAX glue: im2col and layer plumbing
# --------------------------------------------------------------------------

def _im2col_grouped(x, k, stride, pad, groups):
    """x: NHWC (bf16) -> patches (groups, B*Ho*Wo, k*k*Cg), plus Ho, Wo."""
    B, H, W, C = x.shape
    if pad:
        x = jnp.pad(x, ((0, 0), (pad, pad), (pad, pad), (0, 0)))
    Hp, Wp = H + 2 * pad, W + 2 * pad
    Ho = (Hp - k) // stride + 1
    Wo = (Wp - k) // stride + 1
    cols = []
    for dh in range(k):
        for dw in range(k):
            cols.append(x[:, dh:dh + (Ho - 1) * stride + 1:stride,
                            dw:dw + (Wo - 1) * stride + 1:stride, :])
    p = jnp.stack(cols, axis=3)                       # (B, Ho, Wo, k*k, C) bf16
    Cg = C // groups
    p = p.reshape(B, Ho, Wo, k * k, groups, Cg)
    p = jnp.transpose(p, (4, 0, 1, 2, 3, 5)).reshape(
        groups, B * Ho * Wo, k * k * Cg)
    return p, Ho, Wo


@functools.partial(jax.jit,
                   static_argnames=("k", "stride", "pad", "groups", "act", "pool"))
def conv_bn_act(x, w, scale, bias, *, k, stride, pad, groups, act, pool=False):
    """Conv (possibly grouped) + folded eval-mode BN + activation, NHWC, bf16 out.
    If pool=True also returns the fused global average pool (B, Cout) f32."""
    B = x.shape[0]
    x = x.astype(jnp.bfloat16)            # bf16 BEFORE im2col: halves patch HBM traffic
    patches, Ho, Wo = _im2col_grouped(x, k, stride, pad, groups)
    if pool:
        out, pooled = _conv_matmul(patches, w, scale, bias, act=act,
                                   pool_hw=Ho * Wo, pool_batch=B)
        return out.reshape(B, Ho, Wo, -1), pooled
    out = _conv_matmul(patches, w, scale, bias, act=act)
    return out.reshape(B, Ho, Wo, -1)


@jax.jit
def linear(x, w, b):
    """x: (B, K) f32, w: (K, N), b: (1, N) -> (B, N) f32."""
    ones = jnp.ones((w.shape[1],), jnp.float32)
    return _conv_matmul(x[None], w[None], ones, b.reshape(-1),
                        act="none", out_dtype=jnp.float32)


def bottleneck(x, p, stride):
    """SEResNeXtBottleneck (groups=32, base_width=4, SE reduction=16)."""
    c1, c2, c3 = p["conv1"], p["conv2"], p["conv3"]
    out = conv_bn_act(x, c1["w"], c1["scale"], c1["bias"],
                      k=1, stride=1, pad=0, groups=1, act="relu")
    out = conv_bn_act(out, c2["w"], c2["scale"], c2["bias"],
                      k=c2["k"], stride=stride, pad=1, groups=c2["groups"],
                      act="relu")
    # conv3 + BN with the SE global-average-pool fused into the matmul epilogue.
    out, pooled = conv_bn_act(out, c3["w"], c3["scale"], c3["bias"],
                              k=1, stride=1, pad=0, groups=1, act="none",
                              pool=True)
    if "down" in p:
        d = p["down"]
        residual = conv_bn_act(x, d["w"], d["scale"], d["bias"],
                               k=1, stride=stride, pad=0, groups=1, act="none")
    else:
        residual = x
    B, H, W, C = out.shape
    gate = se_gate(pooled, p["se_fc1"]["w"], p["se_fc1"]["b"],
                   p["se_fc2"]["w"], p["se_fc2"]["b"])
    y = se_scale_add_relu(out.reshape(B, H * W, C), gate,
                          residual.reshape(B, H * W, C))
    return y.reshape(B, H, W, C)


def seresnext50_forward(params, x_nchw):
    """Returns (feature (B, 2048) f32, logits (B, 1) f32) like the PyTorch module."""
    x = jnp.transpose(x_nchw, (0, 2, 3, 1)).astype(jnp.float32)   # NCHW -> NHWC
    st = params["stem"]
    x = conv_bn_act(x, st["w"], st["scale"], st["bias"],
                    k=7, stride=2, pad=3, groups=1, act="relu")
    x = maxpool_3x3_s2_ceil(x)
    strides = [1, 2, 2, 2]
    for si, stage in enumerate(params["stages"]):
        for bi, blk in enumerate(stage):
            x = bottleneck(x, blk, strides[si] if bi == 0 else 1)
    B, H, W, C = x.shape
    feature = global_avg_pool(x.reshape(B, H * W, C))             # (B, 2048) f32
    lp = params["last"]
    logits = linear(feature, lp["w"], lp["b"])                    # (B, 1) f32
    return feature, logits


# --------------------------------------------------------------------------
# Deterministic synthetic parameters (shapes follow se_resnext50_32x4d)
# --------------------------------------------------------------------------

def init_params():
    base = jax.random.PRNGKey(42)
    counter = [0]

    def nk():
        counter[0] += 1
        return jax.random.fold_in(base, counter[0])

    def conv_bn(cin, cout, k, groups=1, cout_actual=None):
        cg, ng = cin // groups, cout // groups
        kg = k * k * cg
        w = (jax.random.normal(nk(), (groups, kg, ng), jnp.float32)
             * (1.0 / np.sqrt(kg)))
        gamma = jax.random.uniform(nk(), (cout,), minval=0.7, maxval=1.3)
        beta = 0.05 * jax.random.normal(nk(), (cout,))
        mean = 0.05 * jax.random.normal(nk(), (cout,))
        var = jax.random.uniform(nk(), (cout,), minval=0.8, maxval=1.2)
        scale = gamma * jax.lax.rsqrt(var + 1e-5)
        bias = beta - mean * scale
        if cout_actual is not None and cout_actual < cout:
            # Lane-density padding: channels >= cout_actual get zero scale/bias
            # so they are exactly zero after BN + ReLU.
            ch = jnp.arange(cout) < cout_actual
            scale = jnp.where(ch, scale, 0.0)
            bias = jnp.where(ch, bias, 0.0)
        g_eff = groups
        if groups > 1 and ng < 128:
            # Merge true groups into "super-groups" with block-diagonal weights
            # so each MXU matmul writes a lane-dense 128-wide output block.
            sg = max(1, min(groups, 128 // ng))
            while groups % sg:
                sg -= 1
            if sg > 1:
                gp = groups // sg
                wr = w.reshape(gp, sg, k * k, cg, ng)
                eye = jnp.eye(sg, dtype=w.dtype)
                # Rows ordered (kk, s, cg) to match the im2col patch layout,
                # columns (s, ng); zeros off the block diagonal keep grouped
                # conv semantics exactly.
                w = jnp.einsum("gskcn,st->gksctn", wr, eye).reshape(
                    gp, k * k * sg * cg, sg * ng)
                g_eff = gp
        return dict(k=k, groups=g_eff, w=w.astype(jnp.bfloat16),
                    scale=scale.astype(jnp.float32),
                    bias=bias.astype(jnp.float32))

    def fc(cin, cout):
        w = (jax.random.normal(nk(), (cin, cout), jnp.float32)
             * (1.0 / np.sqrt(cin)))
        b = 0.05 * jax.random.normal(nk(), (cout,))
        return dict(w=w.astype(jnp.bfloat16),
                    b=b.reshape(1, cout).astype(jnp.float32))

    # Stem: conv7x7(3->64) padded to 128 output channels (extra channels exactly
    # zero) so its stores are lane-dense on the largest-spatial layer.
    params = {"stem": conv_bn(3, 128, 7, cout_actual=64)}
    inplanes = 128           # 64 real + 64 zero channels feed stage-1 block 0
    stages = []
    for planes, nblocks in zip([64, 128, 256, 512], [3, 4, 6, 3]):
        width = (planes * 4 // 64) * 32        # ResNeXt: groups=32, base_width=4
        out_ch = planes * 4
        stage = []
        for b in range(nblocks):
            blk = dict(
                conv1=conv_bn(inplanes, width, 1),
                conv2=conv_bn(width, width, 3, groups=32),
                conv3=conv_bn(width, out_ch, 1),
                se_fc1=fc(out_ch, out_ch // 16),
                se_fc2=fc(out_ch // 16, out_ch),
            )
            if b == 0:
                blk["down"] = conv_bn(inplanes, out_ch, 1)
            stage.append(blk)
            inplanes = out_ch
        stages.append(stage)
    params["stages"] = stages
    params["last"] = fc(2048, 1)               # last_linear: 2048 -> 1
    return params


# --------------------------------------------------------------------------

if __name__ == "__main__":
    params = init_params()
    # Small but structurally valid input: NCHW, 3 channels (RGB), 32x32.
    x = jax.random.normal(jax.random.PRNGKey(0), (2, 3, 32, 32), jnp.float32)
    feature, out = seresnext50_forward(params, x)
    feature, out = jax.block_until_ready((feature, out))
    assert feature.shape == (2, 2048), feature.shape
    assert out.shape == (2, 1), out.shape
    assert bool(jnp.all(jnp.isfinite(feature))) and bool(jnp.all(jnp.isfinite(out)))
    print("KERNEL_OK")
</pallas_src>

<mosaic_0001>
module attributes {stable_mosaic.version = 11 : i64} {
  func.func @_conv_matmul_kernel(%arg0: i32, %arg1: i32, %arg2: i32, %arg3: memref<1x512x147xbf16, #tpu.memory_space<vmem>>, %arg4: memref<1x147x128xbf16, #tpu.memory_space<vmem>>, %arg5: memref<1x128xf32, #tpu.memory_space<vmem>>, %arg6: memref<1x128xf32, #tpu.memory_space<vmem>>, %arg7: memref<512x128xbf16, #tpu.memory_space<vmem>>) attributes {dimension_semantics = [#tpu.dimension_semantics<parallel>, #tpu.dimension_semantics<parallel>, #tpu.dimension_semantics<parallel>], iteration_bounds = array<i64: 1, 1, 1>, scalar_prefetch = 0 : i64, scratch_operands = 0 : i64, tpu.core_type = #tpu.core_type<tc>, window_params = [{transform_indices = @transform_0, window_bounds = array<i64: 1, 512, 147>}, {transform_indices = @transform_1, window_bounds = array<i64: 1, 147, 128>}, {transform_indices = @transform_2, window_bounds = array<i64: 1, 128>}, {transform_indices = @transform_3, window_bounds = array<i64: 1, 128>}, {transform_indices = @transform_4, window_bounds = array<i64: 512, 128>}]} {
    %c0 = arith.constant 0 : index
    %c0_0 = arith.constant 0 : index
    %c0_1 = arith.constant 0 : index
    %0 = vector.load %arg3[%c0, %c0_0, %c0_1] : memref<1x512x147xbf16, #tpu.memory_space<vmem>>, vector<1x512x147xbf16>
    %1 = vector.shape_cast %0 : vector<1x512x147xbf16> to vector<512x147xbf16>
    %c0_2 = arith.constant 0 : index
    %c0_3 = arith.constant 0 : index
    %c0_4 = arith.constant 0 : index
    %2 = vector.load %arg4[%c0_2, %c0_3, %c0_4] : memref<1x147x128xbf16, #tpu.memory_space<vmem>>, vector<1x147x128xbf16>
    %3 = vector.shape_cast %2 : vector<1x147x128xbf16> to vector<147x128xbf16>
    %cst = arith.constant dense<0.000000e+00> : vector<512x128xf32>
    %4 = tpu.matmul %1, %3, %cst {dimension_numbers = #tpu.dot_dimension_numbers<[1], [0], [0], [1], [0, 0, 1, 1], [], []>} : vector<512x147xbf16>, vector<147x128xbf16>, vector<512x128xf32> -> vector<512x128xf32>
    %c0_5 = arith.constant 0 : index
    %c0_6 = arith.constant 0 : index
    %5 = vector.load %arg5[%c0_5, %c0_6] : memref<1x128xf32, #tpu.memory_space<vmem>>, vector<1x128xf32>
    %6 = vector.broadcast %5 : vector<1x128xf32> to vector<512x128xf32>
    %7 = arith.mulf %4, %6 : vector<512x128xf32>
    %c0_7 = arith.constant 0 : index
    %c0_8 = arith.constant 0 : index
    %8 = vector.load %arg6[%c0_7, %c0_8] : memref<1x128xf32, #tpu.memory_space<vmem>>, vector<1x128xf32>
    %9 = vector.broadcast %8 : vector<1x128xf32> to vector<512x128xf32>
    %10 = arith.addf %7, %9 : vector<512x128xf32>
    %cst_9 = arith.constant 0.000000e+00 : f32
    %11 = vector.broadcast %cst_9 : f32 to vector<512x128xf32>
    %12 = arith.maximumf %10, %11 : vector<512x128xf32>
    %13 = arith.truncf %12 : vector<512x128xf32> to vector<512x128xbf16>
    %c0_10 = arith.constant 0 : index
    %c0_11 = arith.constant 0 : index
    %14 = vector.load %arg7[%c0_10, %c0_11] : memref<512x128xbf16, #tpu.memory_space<vmem>>, vector<512x128xbf16>
    tpu.vector_store %arg7[%c0_10, %c0_11], %13 {strides = array<i32>} : memref<512x128xbf16, #tpu.memory_space<vmem>>, vector<512x128xbf16>,
    return
  }
  func.func @transform_0(%arg0: i32, %arg1: i32, %arg2: i32) -> (i32, i32, i32) {
    %c0_i32 = arith.constant 0 : i32
    %c0_i32_0 = arith.constant 0 : i32
    return %arg0, %arg2, %c0_i32 : i32, i32, i32
  }
  func.func @transform_1(%arg0: i32, %arg1: i32, %arg2: i32) -> (i32, i32, i32) {
    %c0_i32 = arith.constant 0 : i32
    %c0_i32_0 = arith.constant 0 : i32
    return %arg0, %c0_i32, %arg1 : i32, i32, i32
  }
  func.func @transform_2(%arg0: i32, %arg1: i32, %arg2: i32) -> (i32, i32) {
    %c1_i32 = arith.constant 1 : i32
    %0 = arith.muli %arg0, %c1_i32 : i32
    %1 = arith.addi %0, %arg1 : i32
    %c0_i32 = arith.constant 0 : i32
    %c0_i32_0 = arith.constant 0 : i32
    return %c0_i32, %1 : i32, i32
  }
  func.func @transform_3(%arg0: i32, %arg1: i32, %arg2: i32) -> (i32, i32) {
    %c1_i32 = arith.constant 1 : i32
    %0 = arith.muli %arg0, %c1_i32 : i32
    %1 = arith.addi %0, %arg1 : i32
    %c0_i32 = arith.constant 0 : i32
    %c0_i32_0 = arith.constant 0 : i32
    return %c0_i32, %1 : i32, i32
  }
  func.func @transform_4(%arg0: i32, %arg1: i32, %arg2: i32) -> (i32, i32) {
    %c1_i32 = arith.constant 1 : i32
    %0 = arith.muli %arg0, %c1_i32 : i32
    %1 = arith.addi %0, %arg1 : i32
    %c0_i32 = arith.constant 0 : i32
    return %arg2, %1 : i32, i32
  }
}

</mosaic_0001>

<bundles_post_ra>
// kernel: conv_bn_act.1
= control target key start
LH: loop header
LB: loop body
LE: loop exit
PB: predicated region body
PF: predicated region fallthrough
CT: control target
= control target key end

     0   :  { %v2000_v1 = vmov 0   ;;  %vm476_vm0 = vcmask 154624   ;;  %vm573_vm1 = vcmask 1040384   ;;  %vm574_vm2 = vcmask 1041408   ;;  %s2425_s0 = inlined_call_operand.vmem [shape: bf16[1,512,147], index: 0, kind: input, shape index: {}]   ;;  %s2426_s1 = inlined_call_operand.vmem [shape: bf16[1,147,128], index: 1, kind: input, shape index: {}]   ;;  %s2427_s2 = inlined_call_operand.vmem [shape: f32[1,128], index: 2, kind: input, shape index: {}]   ;;  %s2428_s3 = inlined_call_operand.vmem [shape: f32[1,128], index: 3, kind: input, shape index: {}]   ;;  %s2429_s4 = inlined_call_operand.hbm [shape: bf16[512,128], index: 4, kind: output, shape index: {}]  }
   0x1   :  { %v1872_v0 = vld [vmem:[%s2426_s1 + $0x38] sm:$0xff]   ;;  %580 = vmatprep.subr.bf16.mxu0 %v2000_v1  ;;  %1847 = vmatprep.subr.bf16.mxu1 %v2000_v1  ;;  %v1873_v2 = vld [vmem:[%s2426_s1 + $0x30] sm:$0xff]   ;;  %v1874_v3 = vld [vmem:[%s2426_s1 + $0x28] sm:$0xff]   ;;  %v2001_v10 = vmov 65535  }
   0x2   :  { %581 = vmatpush1.bf16.msra.mxu0 %v1872_v0  ;;  %1857 = vmatpush1.bf16.msra.mxu1 %v1872_v0  ;;  %v1875_v4 = vld [vmem:[%s2426_s1 + $0x20] sm:$0xff]   ;;  %v1876_v7 = vld [vmem:[%s2426_s1 + $0x18] sm:$0xff]   ;;  %v1877_v8 = vld [vmem:[%s2426_s1 + $0x10] sm:$0xff]   ;;  %v575_v11 = vsel %vm573_vm1, 4294967295, %v2001_v10 }
   0x3   :  { %582 = vmatprep.subr.bf16.mxu0 %v2000_v1  ;;  %1848 = vmatprep.subr.bf16.mxu1 %v2000_v1  ;;  %v1884_v5 = vld [vmem:[%s2425_s0 + $0x4] ss:$8 sps:$4 sm:$0xff]   ;;  %v1880_v13 = vld [vmem:[%s2426_s1 + $0x48] ss:$0 sps:$4 sm:$0x33]   ;;  %v576_v14 = vsel %vm574_vm2, %v575_v11, 0 }
   0x4   :  { %1494 = vmatprep.mubr.msk.bf16.mxu0 %vm476_vm0, %v1884_v5  ;;  %v1887_v6 = vld [vmem:[%s2425_s0 + $0x104] ss:$8 sps:$4 sm:$0xff]   ;;  %v578_v15 = vand.u32 %v1880_v13, %v576_v14  ;;  %v1882_v17 = vld [vmem:[%s2425_s0] ss:$8 sps:$4 sm:$0xff]   ;;  %v1888_v19 = vld [vmem:[%s2425_s0 + $0x14] ss:$8 sps:$4 sm:$0xff]  }
   0x5   :  { %1510 = vmatprep.mubr.msk.bf16.mxu1 %vm476_vm0, %v1887_v6  ;;  %v1878_v9 = vld [vmem:[%s2426_s1 + $0x8] sm:$0xff]   ;;  %v1879_v12 = vld [vmem:[%s2426_s1] sm:$0xff]   ;;  %v1890_v20 = vld [vmem:[%s2425_s0 + $0x114] ss:$8 sps:$4 sm:$0xff]  }
   0x6   :  { %583 = vmatpush1.bf16.msra.mxu0 %v1873_v2  ;;  %1858 = vmatpush1.bf16.msra.mxu1 %v1873_v2  ;;  %v1881_v16 = vld [vmem:[%s2426_s1 + $0x40] sm:$0xff]   ;;  %v1892_v21 = vld [vmem:[%s2425_s0 + $0x10] ss:$8 sps:$4 sm:$0xff]  }
   0x7   :  { %584 = vmatprep.subr.bf16.mxu0 %v2000_v1  ;;  %1849 = vmatprep.subr.bf16.mxu1 %v2000_v1  ;;  %v1885_v18 = vld [vmem:[%s2425_s0 + $0x100] ss:$8 sps:$4 sm:$0xff]   ;;  %v1893_v22 = vld [vmem:[%s2425_s0 + $0x110] ss:$8 sps:$4 sm:$0xff]   ;;  %v1894_v23 = vld [vmem:[%s2425_s0 + $0x24] ss:$8 sps:$4 sm:$0xff]  }
   0x8   :  { %v1896_v24 = vld [vmem:[%s2425_s0 + $0x124] ss:$8 sps:$4 sm:$0xff]  }
   0xa   :  { %585 = vmatpush1.bf16.msra.mxu0 %v1874_v3  ;;  %1859 = vmatpush1.bf16.msra.mxu1 %v1874_v3 }
   0xb   :  { %586 = vmatprep.subr.bf16.mxu0 %v2000_v1  ;;  %1850 = vmatprep.subr.bf16.mxu1 %v2000_v1 }
   0xe   :  { %587 = vmatpush1.bf16.msra.mxu0 %v1875_v4  ;;  %1860 = vmatpush1.bf16.msra.mxu1 %v1875_v4 }
   0xf   :  { %588 = vmatprep.subr.bf16.mxu0 %v2000_v1  ;;  %1851 = vmatprep.subr.bf16.mxu1 %v2000_v1 }
  0x12   :  { %589 = vmatpush1.bf16.msra.mxu0 %v1876_v7  ;;  %1861 = vmatpush1.bf16.msra.mxu1 %v1876_v7 }
  0x13   :  { %590 = vmatprep.subr.bf16.mxu0 %v2000_v1  ;;  %1852 = vmatprep.subr.bf16.mxu1 %v2000_v1 }
  0x16   :  { %591 = vmatpush1.bf16.msra.mxu0 %v1877_v8  ;;  %1862 = vmatpush1.bf16.msra.mxu1 %v1877_v8 }
  0x17   :  { %592 = vmatprep.subr.bf16.mxu0 %v2000_v1  ;;  %1853 = vmatprep.subr.bf16.mxu1 %v2000_v1 }
  0x1a   :  { %593 = vmatpush1.bf16.msra.mxu0 %v1878_v9  ;;  %1863 = vmatpush1.bf16.msra.mxu1 %v1878_v9 }
  0x1b   :  { %594 = vmatprep.subr.bf16.mxu0 %v2000_v1  ;;  %1854 = vmatprep.subr.bf16.mxu1 %v2000_v1 }
  0x1e   :  { %595 = vmatpush1.bf16.msra.mxu0 %v1879_v12  ;;  %1864 = vmatpush1.bf16.msra.mxu1 %v1879_v12 }
  0x1f   :  { %608 = vmatprep.subr.bf16.mxu0 %v2000_v1  ;;  %1855 = vmatprep.subr.bf16.mxu1 %v2000_v1 }
  0x22   :  { %609 = vmatpush2.bf16.msra.mxu0 %v578_v15  ;;  %1865 = vmatpush2.bf16.msra.mxu1 %v578_v15 }
  0x23   :  { %610 = vmatprep.subr.bf16.mxu0 %v2000_v1  ;;  %1856 = vmatprep.subr.bf16.mxu1 %v2000_v1 }
  0x26   :  { %611 = vmatpush2.bf16.msra.mxu0 %v1881_v16  ;;  %1866 = vmatpush2.bf16.msra.mxu1 %v1881_v16 }
  0x29   :  { %613 = vmatmul.mubr.bf16.vlgmr.msra.gmra.mxu0 %v1882_v17  ;;  %741 = vmatmul.mubr.bf16.vlgmr.msra.gmra.mxu1 %v1885_v18 }
  0x2a   :  { %1495 = vmatprep.mubr.msk.bf16.mxu0 %vm476_vm0, %v1888_v19  ;;  %1511 = vmatprep.mubr.msk.bf16.mxu1 %vm476_vm0, %v1890_v20 }
  0x31   :  { %621 = vmatmul.mubr.bf16.gmra.mxu0 %v1892_v21  ;;  %749 = vmatmul.mubr.bf16.gmra.mxu1 %v1893_v22 }
  0x32   :  { %1496 = vmatprep.mubr.msk.bf16.mxu0 %vm476_vm0, %v1894_v23  ;;  %1512 = vmatprep.mubr.msk.bf16.mxu1 %vm476_vm0, %v1896_v24 }
  0x33   :  { %9 = vsyncpa [#allocation3], 0  ;;  %v1898_v25 = vld [vmem:[%s2425_s0 + $0x20] ss:$8 sps:$4 sm:$0xff]   ;;  %v1900_v27 = vld [vmem:[%s2425_s0 + $0x34] ss:$8 sps:$4 sm:$0xff]  }
  0x34   :  { %v1899_v26 = vld [vmem:[%s2425_s0 + $0x120] ss:$8 sps:$4 sm:$0xff]   ;;  %v1902_v28 = vld [vmem:[%s2425_s0 + $0x134] ss:$8 sps:$4 sm:$0xff]   ;;  %v1904_v29 = vld [vmem:[%s2425_s0 + $0x30] ss:$8 sps:$4 sm:$0xff]  }
  0x35   :  { %v1905_v30 = vld [vmem:[%s2425_s0 + $0x130] ss:$8 sps:$4 sm:$0xff]   ;;  %v1906_v31 = vld [vmem:[%s2425_s0 + $0x44] ss:$8 sps:$4 sm:$0xff]   ;;  %v1910_v33 = vld [vmem:[%s2425_s0 + $0x40] ss:$8 sps:$4 sm:$0xff]  }
  0x36   :  { %v1908_v32 = vld [vmem:[%s2425_s0 + $0x144] ss:$8 sps:$4 sm:$0xff]   ;;  %v1911_v34 = vld [vmem:[%s2425_s0 + $0x140] ss:$8 sps:$4 sm:$0xff]   ;;  %v1912_v35 = vld [vmem:[%s2425_s0 + $0x54] ss:$8 sps:$4 sm:$0xff]  }
  0x37   :  { %v1914_v36 = vld [vmem:[%s2425_s0 + $0x154] ss:$8 sps:$4 sm:$0xff]   ;;  %v1916_v37 = vld [vmem:[%s2425_s0 + $0x50] ss:$8 sps:$4 sm:$0xff]   ;;  %v1918_v39 = vld [vmem:[%s2425_s0 + $0x64] ss:$8 sps:$4 sm:$0xff]  }
  0x38   :  { %v1917_v38 = vld [vmem:[%s2425_s0 + $0x150] ss:$8 sps:$4 sm:$0xff]   ;;  %v1920_v40 = vld [vmem:[%s2425_s0 + $0x164] ss:$8 sps:$4 sm:$0xff]   ;;  %v1922_v41 = vld [vmem:[%s2425_s0 + $0x60] ss:$8 sps:$4 sm:$0xff]  }
  0x39   :  { %629 = vmatmul.mubr.bf16.gmra.mxu0 %v1898_v25  ;;  %757 = vmatmul.mubr.bf16.gmra.mxu1 %v1899_v26  ;;  %v1923_v42 = vld [vmem:[%s2425_s0 + $0x160] ss:$8 sps:$4 sm:$0xff]   ;;  %v1924_v43 = vld [vmem:[%s2425_s0 + $0x74] ss:$8 sps:$4 sm:$0xff]   ;;  %v1928_v45 = vld [vmem:[%s2425_s0 + $0x70] ss:$8 sps:$4 sm:$0xff]  }
  0x3a   :  { %1497 = vmatprep.mubr.msk.bf16.mxu0 %vm476_vm0, %v1900_v27  ;;  %1513 = vmatprep.mubr.msk.bf16.mxu1 %vm476_vm0, %v1902_v28  ;;  %v1926_v44 = vld [vmem:[%s2425_s0 + $0x174] ss:$8 sps:$4 sm:$0xff]   ;;  %v1929_v46 = vld [vmem:[%s2425_s0 + $0x170] ss:$8 sps:$4 sm:$0xff]   ;;  %v1930_v47 = vld [vmem:[%s2425_s0 + $0x84] ss:$8 sps:$4 sm:$0xff]  }
  0x3b   :  { %v1932_v48 = vld [vmem:[%s2425_s0 + $0x184] ss:$8 sps:$4 sm:$0xff]   ;;  %v1934_v49 = vld [vmem:[%s2425_s0 + $0x80] ss:$8 sps:$4 sm:$0xff]   ;;  %v1936_v51 = vld [vmem:[%s2425_s0 + $0x94] ss:$8 sps:$4 sm:$0xff]  }
  0x3c   :  { %v1935_v50 = vld [vmem:[%s2425_s0 + $0x180] ss:$8 sps:$4 sm:$0xff]   ;;  %v1938_v52 = vld [vmem:[%s2425_s0 + $0x194] ss:$8 sps:$4 sm:$0xff]   ;;  %v1940_v53 = vld [vmem:[%s2425_s0 + $0x90] ss:$8 sps:$4 sm:$0xff]  }
  0x3d   :  { %v1941_v54 = vld [vmem:[%s2425_s0 + $0x190] ss:$8 sps:$4 sm:$0xff]   ;;  %v1942_v55 = vld [vmem:[%s2425_s0 + $0xa4] ss:$8 sps:$4 sm:$0xff]   ;;  %v1946_v57 = vld [vmem:[%s2425_s0 + $0xa0] ss:$8 sps:$4 sm:$0xff]  }
  0x3e   :  { %v1944_v56 = vld [vmem:[%s2425_s0 + $0x1a4] ss:$8 sps:$4 sm:$0xff]   ;;  %v1947_v58 = vld [vmem:[%s2425_s0 + $0x1a0] ss:$8 sps:$4 sm:$0xff]   ;;  %v1948_v59 = vld [vmem:[%s2425_s0 + $0xb4] ss:$8 sps:$4 sm:$0xff]  }
  0x3f   :  { %v1950_v60 = vld [vmem:[%s2425_s0 + $0x1b4] ss:$8 sps:$4 sm:$0xff]   ;;  %v1952_v61 = vld [vmem:[%s2425_s0 + $0xb0] ss:$8 sps:$4 sm:$0xff]   ;;  %v1954_v63 = vld [vmem:[%s2425_s0 + $0xc4] ss:$8 sps:$4 sm:$0xff]  }
  0x40   :  { %v1953_v62 = vld [vmem:[%s2425_s0 + $0x1b0] ss:$8 sps:$4 sm:$0xff]   ;;  %v1956_v0 = vld [vmem:[%s2425_s0 + $0x1c4] ss:$8 sps:$4 sm:$0xff]   ;;  %v1958_v1 = vld [vmem:[%s2425_s0 + $0xc0] ss:$8 sps:$4 sm:$0xff]  }
  0x41   :  { %637 = vmatmul.mubr.bf16.gmra.mxu0 %v1904_v29  ;;  %765 = vmatmul.mubr.bf16.gmra.mxu1 %v1905_v30  ;;  %v1959_v2 = vld [vmem:[%s2425_s0 + $0x1c0] ss:$8 sps:$4 sm:$0xff]   ;;  %v1960_v3 = vld [vmem:[%s2425_s0 + $0xd4] ss:$8 sps:$4 sm:$0xff]   ;;  %v1964_v5 = vld [vmem:[%s2425_s0 + $0xd0] ss:$8 sps:$4 sm:$0xff]  }
  0x42   :  { %1498 = vmatprep.mubr.msk.bf16.mxu0 %vm476_vm0, %v1906_v31  ;;  %1514 = vmatprep.mubr.msk.bf16.mxu1 %vm476_vm0, %v1908_v32  ;;  %v1962_v4 = vld [vmem:[%s2425_s0 + $0x1d4] ss:$8 sps:$4 sm:$0xff]   ;;  %v1965_v6 = vld [vmem:[%s2425_s0 + $0x1d0] ss:$8 sps:$4 sm:$0xff]   ;;  %v1966_v7 = vld [vmem:[%s2425_s0 + $0xe4] ss:$8 sps:$4 sm:$0xff]  }
  0x43   :  { %v1968_v8 = vld [vmem:[%s2425_s0 + $0x1e4] ss:$8 sps:$4 sm:$0xff]   ;;  %v1970_v9 = vld [vmem:[%s2425_s0 + $0xe0] ss:$8 sps:$4 sm:$0xff]   ;;  %v1972_v11 = vld [vmem:[%s2425_s0 + $0xf4] ss:$8 sps:$4 sm:$0xff]  }
  0x44   :  { %v1971_v10 = vld [vmem:[%s2425_s0 + $0x1e0] ss:$8 sps:$4 sm:$0xff]   ;;  %v1974_v12 = vld [vmem:[%s2425_s0 + $0x1f4] ss:$8 sps:$4 sm:$0xff]   ;;  %v1976_v13 = vld [vmem:[%s2425_s0 + $0xf0] ss:$8 sps:$4 sm:$0xff]  }
  0x45   :  { %v1977_v14 = vld [vmem:[%s2425_s0 + $0x1f0] ss:$8 sps:$4 sm:$0xff]   ;;  %v2287_v15 = vld [vmem:[%s2427_s2] ss:$0 sm:$0xff]  ;;  %s2002_s0 = smov [#allocation2]  }
  0x46   :  { %v2293_v19 = vld [vmem:[%s2428_s3] ss:$0 sm:$0xff]  ;;  %s1403_s2 = sshll.u32 %s2002_s0, 4  ;;  %s1404_s2 = int_to_ptr.vmem [resolvable:$true] %s1403_s2 }
  0x47   :  { %s1978_s3 = scalar_lea.vmem %s1404_s2, 4096  ;;  %p1983_p1 = scmp.lt.s32.totalorder %s1404_s2, %s1404_s2 }
  0x48   :  { %p1979_p0 = scmp.ne.s32.totalorder %s1404_s2, %s1978_s3  ;;  %p1984_p2 = scmp.lt.s32.totalorder %s1978_s3, %s1978_s3 }
  0x49   :  { %645 = vmatmul.mubr.bf16.gmra.mxu0 %v1910_v33  ;;  %773 = vmatmul.mubr.bf16.gmra.mxu1 %v1911_v34 }
  0x4a   :  { %1499 = vmatprep.mubr.msk.bf16.mxu0 %vm476_vm0, %v1912_v35  ;;  %1515 = vmatprep.mubr.msk.bf16.mxu1 %vm476_vm0, %v1914_v36  ;;  %p1985_p3 = por %p1984_p2, %p1983_p1 }
  0x4c   :  { %p1986_p4 = pnand %p1985_p3, %p1979_p0 }
  0x51   :  { %653 = vmatmul.mubr.bf16.gmra.mxu0 %v1916_v37  ;;  %781 = vmatmul.mubr.bf16.gmra.mxu1 %v1917_v38 }
  0x52   :  { %1500 = vmatprep.mubr.msk.bf16.mxu0 %vm476_vm0, %v1918_v39  ;;  %1516 = vmatprep.mubr.msk.bf16.mxu1 %vm476_vm0, %v1920_v40 }
  0x59   :  { %661 = vmatmul.mubr.bf16.gmra.mxu0 %v1922_v41  ;;  %789 = vmatmul.mubr.bf16.gmra.mxu1 %v1923_v42 }
  0x5a   :  { %1501 = vmatprep.mubr.msk.bf16.mxu0 %vm476_vm0, %v1924_v43  ;;  %1517 = vmatprep.mubr.msk.bf16.mxu1 %vm476_vm0, %v1926_v44 }
  0x61   :  { %669 = vmatmul.mubr.bf16.gmra.mxu0 %v1928_v45  ;;  %797 = vmatmul.mubr.bf16.gmra.mxu1 %v1929_v46 }
  0x62   :  { %1502 = vmatprep.mubr.msk.bf16.mxu0 %vm476_vm0, %v1930_v47  ;;  %1518 = vmatprep.mubr.msk.bf16.mxu1 %vm476_vm0, %v1932_v48 }
  0x69   :  { %677 = vmatmul.mubr.bf16.gmra.mxu0 %v1934_v49  ;;  %805 = vmatmul.mubr.bf16.gmra.mxu1 %v1935_v50 }
  0x6a   :  { %1503 = vmatprep.mubr.msk.bf16.mxu0 %vm476_vm0, %v1936_v51  ;;  %1519 = vmatprep.mubr.msk.bf16.mxu1 %vm476_vm0, %v1938_v52 }
  0x71   :  { %685 = vmatmul.mubr.bf16.gmra.mxu0 %v1940_v53  ;;  %813 = vmatmul.mubr.bf16.gmra.mxu1 %v1941_v54 }
  0x72   :  { %1504 = vmatprep.mubr.msk.bf16.mxu0 %vm476_vm0, %v1942_v55  ;;  %1520 = vmatprep.mubr.msk.bf16.mxu1 %vm476_vm0, %v1944_v56 }
  0x79   :  { %693 = vmatmul.mubr.bf16.gmra.mxu0 %v1946_v57  ;;  %821 = vmatmul.mubr.bf16.gmra.mxu1 %v1947_v58 }
  0x7a   :  { %1505 = vmatprep.mubr.msk.bf16.mxu0 %vm476_vm0, %v1948_v59  ;;  %1521 = vmatprep.mubr.msk.bf16.mxu1 %vm476_vm0, %v1950_v60 }
  0x81   :  { %701 = vmatmul.mubr.bf16.gmra.mxu0 %v1952_v61  ;;  %829 = vmatmul.mubr.bf16.gmra.mxu1 %v1953_v62 }
  0x82   :  { %1506 = vmatprep.mubr.msk.bf16.mxu0 %vm476_vm0, %v1954_v63  ;;  %1522 = vmatprep.mubr.msk.bf16.mxu1 %vm476_vm0, %v1956_v0 }
  0x89   :  { %709 = vmatmul.mubr.bf16.gmra.mxu0 %v1958_v1  ;;  %837 = vmatmul.mubr.bf16.gmra.mxu1 %v1959_v2 }
  0x8a   :  { %1507 = vmatprep.mubr.msk.bf16.mxu0 %vm476_vm0, %v1960_v3  ;;  %1523 = vmatprep.mubr.msk.bf16.mxu1 %vm476_vm0, %v1962_v4 }
  0x91   :  { %717 = vmatmul.mubr.bf16.gmra.mxu0 %v1964_v5  ;;  %845 = vmatmul.mubr.bf16.gmra.mxu1 %v1965_v6 }
  0x92   :  { %1508 = vmatprep.mubr.msk.bf16.mxu0 %vm476_vm0, %v1966_v7  ;;  %1524 = vmatprep.mubr.msk.bf16.mxu1 %vm476_vm0, %v1968_v8 }
  0x99   :  { %725 = vmatmul.mubr.bf16.gmra.mxu0 %v1970_v9  ;;  %853 = vmatmul.mubr.bf16.gmra.mxu1 %v1971_v10 }
  0x9a   :  { %1509 = vmatprep.mubr.msk.bf16.mxu0 %vm476_vm0, %v1972_v11  ;;  %1525 = vmatprep.mubr.msk.bf16.mxu1 %vm476_vm0, %v1974_v12 }
  0xa1   :  { %733 = vmatmul.mubr.bf16.gmra.mxu0 %v1976_v13  ;;  %861 = vmatmul.mubr.bf16.gmra.mxu1 %v1977_v14 }
  0xe9   :  { %v614_v16 = vpop.f32.mrf.mxu0  ;;  %v742_v17 = vpop.f32.mrf.mxu1 }
  0xea   :  { %v876_v18 = vmul.f32 %v2287_v15, %v614_v16  ;;  %v908_v20 = vmul.f32 %v2287_v15, %v742_v17 }
  0xeb   :  { %v616_v21 = vpop.f32.mrf.mxu0  ;;  %v744_v22 = vpop.f32.mrf.mxu1 }
  0xec   :  { %v947_v23 = vadd.f32 %v2293_v19, %v876_v18  ;;  %v979_v24 = vadd.f32 %v2293_v19, %v908_v20 }
  0xed   :  { %v617_v25 = vpop.f32.mrf.mxu0  ;;  %v745_v26 = vpop.f32.mrf.mxu1 }
  0xee   :  { %v877_v27 = vmul.f32 %v2287_v15, %v617_v25  ;;  %v909_v28 = vmul.f32 %v2287_v15, %v745_v26  ;;  %v1011_v33 = vmax.f32 %v947_v23, 0.0  ;;  %v1043_v34 = vmax.f32 %v979_v24, 0.0 }
  0xef   :  { %v619_v29 = vpop.f32.mrf.mxu0  ;;  %v747_v30 = vpop.f32.mrf.mxu1 }
  0xf0   :  { %v948_v31 = vadd.f32 %v2293_v19, %v877_v27  ;;  %v980_v32 = vadd.f32 %v2293_v19, %v909_v28 }
  0xf1   :  { %v622_v35 = vpop.f32.mrf.mxu0  ;;  %v750_v36 = vpop.f32.mrf.mxu1 }
  0xf2   :  { %v1012_v37 = vmax.f32 %v948_v31, 0.0  ;;  %v1044_v38 = vmax.f32 %v980_v32, 0.0  ;;  %v878_v39 = vmul.f32 %v2287_v15, %v622_v35  ;;  %v910_v40 = vmul.f32 %v2287_v15, %v750_v36 }
  0xf3   :  { %v624_v41 = vpop.f32.mrf.mxu0  ;;  %v752_v42 = vpop.f32.mrf.mxu1 }
  0xf4   :  { %v1659_v43 = vpack.c.bf16 %v1012_v37, %v1011_v33  ;;  %v1739_v44 = vpack.c.bf16 %v1044_v38, %v1043_v34  ;;  %v949_v45 = vadd.f32 %v2293_v19, %v878_v39  ;;  %v981_v46 = vadd.f32 %v2293_v19, %v910_v40 }
  0xf5   :  { %v625_v47 = vpop.f32.mrf.mxu0  ;;  %v753_v48 = vpop.f32.mrf.mxu1 }
  0xf6   :  { %1660 = vst [vmem:[#allocation2] sm:$0xff] %v1659_v43   ;;  %1831 = vst [vmem:[#allocation2 + $0x80] sm:$0xff] %v1739_v44   ;;  %v879_v49 = vmul.f32 %v2287_v15, %v625_v47  ;;  %v911_v50 = vmul.f32 %v2287_v15, %v753_v48  ;;  %v1013_v55 = vmax.f32 %v949_v45, 0.0  ;;  %v1045_v56 = vmax.f32 %v981_v46, 0.0 }
  0xf7   :  { %v627_v51 = vpop.f32.mrf.mxu0  ;;  %v755_v52 = vpop.f32.mrf.mxu1 }
  0xf8   :  { %v950_v53 = vadd.f32 %v2293_v19, %v879_v49  ;;  %v982_v54 = vadd.f32 %v2293_v19, %v911_v50 }
  0xf9   :  { %v630_v57 = vpop.f32.mrf.mxu0  ;;  %v758_v58 = vpop.f32.mrf.mxu1 }
  0xfa   :  { %v1014_v59 = vmax.f32 %v950_v53, 0.0  ;;  %v1046_v60 = vmax.f32 %v982_v54, 0.0  ;;  %v880_v61 = vmul.f32 %v2287_v15, %v630_v57  ;;  %v912_v62 = vmul.f32 %v2287_v15, %v758_v58 }
  0xfb   :  { %v632_v63 = vpop.f32.mrf.mxu0  ;;  %v760_v0 = vpop.f32.mrf.mxu1 }
  0xfc   :  { %v1664_v1 = vpack.c.bf16 %v1014_v59, %v1013_v55  ;;  %v1744_v2 = vpack.c.bf16 %v1046_v60, %v1045_v56  ;;  %v951_v3 = vadd.f32 %v2293_v19, %v880_v61  ;;  %v983_v4 = vadd.f32 %v2293_v19, %v912_v62 }
  0xfd   :  { %v633_v5 = vpop.f32.mrf.mxu0  ;;  %v761_v6 = vpop.f32.mrf.mxu1 }
  0xfe   :  { %1816 = vst [vmem:[#allocation2 + $0x8] sm:$0xff] %v1664_v1   ;;  %1832 = vst [vmem:[#allocation2 + $0x88] sm:$0xff] %v1744_v2   ;;  %v881_v7 = vmul.f32 %v2287_v15, %v633_v5  ;;  %v913_v8 = vmul.f32 %v2287_v15, %v761_v6  ;;  %v1015_v13 = vmax.f32 %v951_v3, 0.0  ;;  %v1047_v14 = vmax.f32 %v983_v4, 0.0 }
  0xff   :  { %v635_v9 = vpop.f32.mrf.mxu0  ;;  %v763_v10 = vpop.f32.mrf.mxu1 }
 0x100   :  { %v952_v11 = vadd.f32 %v2293_v19, %v881_v7  ;;  %v984_v12 = vadd.f32 %v2293_v19, %v913_v8 }
 0x101   :  { %v638_v16 = vpop.f32.mrf.mxu0  ;;  %v766_v17 = vpop.f32.mrf.mxu1 }
 0x102   :  { %v1016_v18 = vmax.f32 %v952_v11, 0.0  ;;  %v1048_v20 = vmax.f32 %v984_v12, 0.0  ;;  %v882_v21 = vmul.f32 %v2287_v15, %v638_v16  ;;  %v914_v22 = vmul.f32 %v2287_v15, %v766_v17 }
 0x103   :  { %v640_v23 = vpop.f32.mrf.mxu0  ;;  %v768_v24 = vpop.f32.mrf.mxu1 }
 0x104   :  { %v1669_v25 = vpack.c.bf16 %v1016_v18, %v1015_v13  ;;  %v1749_v26 = vpack.c.bf16 %v1048_v20, %v1047_v14  ;;  %v953_v27 = vadd.f32 %v2293_v19, %v882_v21  ;;  %v985_v28 = vadd.f32 %v2293_v19, %v914_v22 }
 0x105   :  { %v641_v29 = vpop.f32.mrf.mxu0  ;;  %v769_v30 = vpop.f32.mrf.mxu1 }
 0x106   :  { %1817 = vst [vmem:[#allocation2 + $0x10] sm:$0xff] %v1669_v25   ;;  %1833 = vst [vmem:[#allocation2 + $0x90] sm:$0xff] %v1749_v26   ;;  %v883_v31 = vmul.f32 %v2287_v15, %v641_v29  ;;  %v915_v32 = vmul.f32 %v2287_v15, %v769_v30  ;;  %v1017_v37 = vmax.f32 %v953_v27, 0.0  ;;  %v1049_v38 = vmax.f32 %v985_v28, 0.0 }
 0x107   :  { %v643_v33 = vpop.f32.mrf.mxu0  ;;  %v771_v34 = vpop.f32.mrf.mxu1 }
 0x108   :  { %v954_v35 = vadd.f32 %v2293_v19, %v883_v31  ;;  %v986_v36 = vadd.f32 %v2293_v19, %v915_v32 }
 0x109   :  { %v646_v39 = vpop.f32.mrf.mxu0  ;;  %v774_v40 = vpop.f32.mrf.mxu1 }
 0x10a   :  { %v1018_v41 = vmax.f32 %v954_v35, 0.0  ;;  %v1050_v42 = vmax.f32 %v986_v36, 0.0  ;;  %v884_v43 = vmul.f32 %v2287_v15, %v646_v39  ;;  %v916_v44 = vmul.f32 %v2287_v15, %v774_v40 }
 0x10b   :  { %v648_v45 = vpop.f32.mrf.mxu0  ;;  %v776_v46 = vpop.f32.mrf.mxu1 }
 0x10c   :  { %v1674_v47 = vpack.c.bf16 %v1018_v41, %v1017_v37  ;;  %v1754_v48 = vpack.c.bf16 %v1050_v42, %v1049_v38  ;;  %v955_v49 = vadd.f32 %v2293_v19, %v884_v43  ;;  %v987_v50 = vadd.f32 %v2293_v19, %v916_v44 }
 0x10d   :  { %v649_v51 = vpop.f32.mrf.mxu0  ;;  %v777_v52 = vpop.f32.mrf.mxu1 }
 0x10e   :  { %1818 = vst [vmem:[#allocation2 + $0x18] sm:$0xff] %v1674_v47   ;;  %1834 = vst [vmem:[#allocation2 + $0x98] sm:$0xff] %v1754_v48   ;;  %v885_v53 = vmul.f32 %v2287_v15, %v649_v51  ;;  %v917_v54 = vmul.f32 %v2287_v15, %v777_v52  ;;  %v1019_v59 = vmax.f32 %v955_v49, 0.0  ;;  %v1051_v60 = vmax.f32 %v987_v50, 0.0 }
 0x10f   :  { %v651_v55 = vpop.f32.mrf.mxu0  ;;  %v779_v56 = vpop.f32.mrf.mxu1 }
 0x110   :  { %v956_v57 = vadd.f32 %v2293_v19, %v885_v53  ;;  %v988_v58 = vadd.f32 %v2293_v19, %v917_v54 }
 0x111   :  { %v654_v61 = vpop.f32.mrf.mxu0  ;;  %v782_v62 = vpop.f32.mrf.mxu1 }
 0x112   :  { %v1020_v63 = vmax.f32 %v956_v57, 0.0  ;;  %v1052_v0 = vmax.f32 %v988_v58, 0.0  ;;  %v886_v1 = vmul.f32 %v2287_v15, %v654_v61  ;;  %v918_v2 = vmul.f32 %v2287_v15, %v782_v62 }
 0x113   :  { %v656_v3 = vpop.f32.mrf.mxu0  ;;  %v784_v4 = vpop.f32.mrf.mxu1 }
 0x114   :  { %v1679_v5 = vpack.c.bf16 %v1020_v63, %v1019_v59  ;;  %v1759_v6 = vpack.c.bf16 %v1052_v0, %v1051_v60  ;;  %v957_v7 = vadd.f32 %v2293_v19, %v886_v1  ;;  %v989_v8 = vadd.f32 %v2293_v19, %v918_v2 }
 0x115   :  { %v657_v9 = vpop.f32.mrf.mxu0  ;;  %v785_v10 = vpop.f32.mrf.mxu1 }
 0x116   :  { %1819 = vst [vmem:[#allocation2 + $0x20] sm:$0xff] %v1679_v5   ;;  %1835 = vst [vmem:[#allocation2 + $0xa0] sm:$0xff] %v1759_v6   ;;  %v887_v11 = vmul.f32 %v2287_v15, %v657_v9  ;;  %v919_v12 = vmul.f32 %v2287_v15, %v785_v10  ;;  %v1021_v18 = vmax.f32 %v957_v7, 0.0  ;;  %v1053_v20 = vmax.f32 %v989_v8, 0.0 }
 0x117   :  { %v659_v13 = vpop.f32.mrf.mxu0  ;;  %v787_v14 = vpop.f32.mrf.mxu1 }
 0x118   :  { %v958_v16 = vadd.f32 %v2293_v19, %v887_v11  ;;  %v990_v17 = vadd.f32 %v2293_v19, %v919_v12 }
 0x119   :  { %v662_v21 = vpop.f32.mrf.mxu0  ;;  %v790_v22 = vpop.f32.mrf.mxu1 }
 0x11a   :  { %v1022_v23 = vmax.f32 %v958_v16, 0.0  ;;  %v1054_v24 = vmax.f32 %v990_v17, 0.0  ;;  %v888_v25 = vmul.f32 %v2287_v15, %v662_v21  ;;  %v920_v26 = vmul.f32 %v2287_v15, %v790_v22 }
 0x11b   :  { %v664_v27 = vpop.f32.mrf.mxu0  ;;  %v792_v28 = vpop.f32.mrf.mxu1 }
 0x11c   :  { %v1684_v29 = vpack.c.bf16 %v1022_v23, %v1021_v18  ;;  %v1764_v30 = vpack.c.bf16 %v1054_v24, %v1053_v20  ;;  %v959_v31 = vadd.f32 %v2293_v19, %v888_v25  ;;  %v991_v32 = vadd.f32 %v2293_v19, %v920_v26 }
 0x11d   :  { %v665_v33 = vpop.f32.mrf.mxu0  ;;  %v793_v34 = vpop.f32.mrf.mxu1 }
 0x11e   :  { %1820 = vst [vmem:[#allocation2 + $0x28] sm:$0xff] %v1684_v29   ;;  %1836 = vst [vmem:[#allocation2 + $0xa8] sm:$0xff] %v1764_v30   ;;  %v889_v35 = vmul.f32 %v2287_v15, %v665_v33  ;;  %v921_v36 = vmul.f32 %v2287_v15, %v793_v34  ;;  %v1023_v41 = vmax.f32 %v959_v31, 0.0  ;;  %v1055_v42 = vmax.f32 %v991_v32, 0.0 }
 0x11f   :  { %v667_v37 = vpop.f32.mrf.mxu0  ;;  %v795_v38 = vpop.f32.mrf.mxu1 }
 0x120   :  { %v960_v39 = vadd.f32 %v2293_v19, %v889_v35  ;;  %v992_v40 = vadd.f32 %v2293_v19, %v921_v36 }
 0x121   :  { %v670_v43 = vpop.f32.mrf.mxu0  ;;  %v798_v44 = vpop.f32.mrf.mxu1 }
 0x122   :  { %v1024_v45 = vmax.f32 %v960_v39, 0.0  ;;  %v1056_v46 = vmax.f32 %v992_v40, 0.0  ;;  %v890_v47 = vmul.f32 %v2287_v15, %v670_v43  ;;  %v922_v48 = vmul.f32 %v2287_v15, %v798_v44 }
 0x123   :  { %v672_v49 = vpop.f32.mrf.mxu0  ;;  %v800_v50 = vpop.f32.mrf.mxu1 }
 0x124   :  { %v1689_v51 = vpack.c.bf16 %v1024_v45, %v1023_v41  ;;  %v1769_v52 = vpack.c.bf16 %v1056_v46, %v1055_v42  ;;  %v961_v53 = vadd.f32 %v2293_v19, %v890_v47  ;;  %v993_v54 = vadd.f32 %v2293_v19, %v922_v48 }
 0x125   :  { %v673_v55 = vpop.f32.mrf.mxu0  ;;  %v801_v56 = vpop.f32.mrf.mxu1 }
 0x126   :  { %1821 = vst [vmem:[#allocation2 + $0x30] sm:$0xff] %v1689_v51   ;;  %1837 = vst [vmem:[#allocation2 + $0xb0] sm:$0xff] %v1769_v52   ;;  %v891_v57 = vmul.f32 %v2287_v15, %v673_v55  ;;  %v923_v58 = vmul.f32 %v2287_v15, %v801_v56  ;;  %v1025_v63 = vmax.f32 %v961_v53, 0.0  ;;  %v1057_v0 = vmax.f32 %v993_v54, 0.0 }
 0x127   :  { %v675_v59 = vpop.f32.mrf.mxu0  ;;  %v803_v60 = vpop.f32.mrf.mxu1 }
 0x128   :  { %v962_v61 = vadd.f32 %v2293_v19, %v891_v57  ;;  %v994_v62 = vadd.f32 %v2293_v19, %v923_v58 }
 0x129   :  { %v678_v1 = vpop.f32.mrf.mxu0  ;;  %v806_v2 = vpop.f32.mrf.mxu1 }
 0x12a   :  { %v1026_v3 = vmax.f32 %v962_v61, 0.0  ;;  %v1058_v4 = vmax.f32 %v994_v62, 0.0  ;;  %v892_v5 = vmul.f32 %v2287_v15, %v678_v1  ;;  %v924_v6 = vmul.f32 %v2287_v15, %v806_v2 }
 0x12b   :  { %v680_v7 = vpop.f32.mrf.mxu0  ;;  %v808_v8 = vpop.f32.mrf.mxu1 }
 0x12c   :  { %v1694_v9 = vpack.c.bf16 %v1026_v3, %v1025_v63  ;;  %v1774_v10 = vpack.c.bf16 %v1058_v4, %v1057_v0  ;;  %v963_v11 = vadd.f32 %v2293_v19, %v892_v5  ;;  %v995_v12 = vadd.f32 %v2293_v19, %v924_v6 }
 0x12d   :  { %v681_v13 = vpop.f32.mrf.mxu0  ;;  %v809_v14 = vpop.f32.mrf.mxu1 }
 0x12e   :  { %1822 = vst [vmem:[#allocation2 + $0x38] sm:$0xff] %v1694_v9   ;;  %1838 = vst [vmem:[#allocation2 + $0xb8] sm:$0xff] %v1774_v10   ;;  %v893_v16 = vmul.f32 %v2287_v15, %v681_v13  ;;  %v925_v17 = vmul.f32 %v2287_v15, %v809_v14  ;;  %v1027_v23 = vmax.f32 %v963_v11, 0.0  ;;  %v1059_v24 = vmax.f32 %v995_v12, 0.0 }
 0x12f   :  { %v683_v18 = vpop.f32.mrf.mxu0  ;;  %v811_v20 = vpop.f32.mrf.mxu1 }
 0x130   :  { %v964_v21 = vadd.f32 %v2293_v19, %v893_v16  ;;  %v996_v22 = vadd.f32 %v2293_v19, %v925_v17 }
 0x131   :  { %v686_v25 = vpop.f32.mrf.mxu0  ;;  %v814_v26 = vpop.f32.mrf.mxu1 }
 0x132   :  { %v1028_v27 = vmax.f32 %v964_v21, 0.0  ;;  %v1060_v28 = vmax.f32 %v996_v22, 0.0  ;;  %v894_v29 = vmul.f32 %v2287_v15, %v686_v25  ;;  %v926_v30 = vmul.f32 %v2287_v15, %v814_v26 }
 0x133   :  { %v688_v31 = vpop.f32.mrf.mxu0  ;;  %v816_v32 = vpop.f32.mrf.mxu1 }
 0x134   :  { %v1699_v33 = vpack.c.bf16 %v1028_v27, %v1027_v23  ;;  %v1779_v34 = vpack.c.bf16 %v1060_v28, %v1059_v24  ;;  %v965_v35 = vadd.f32 %v2293_v19, %v894_v29  ;;  %v997_v36 = vadd.f32 %v2293_v19, %v926_v30 }
 0x135   :  { %v689_v37 = vpop.f32.mrf.mxu0  ;;  %v817_v38 = vpop.f32.mrf.mxu1 }
 0x136   :  { %1823 = vst [vmem:[#allocation2 + $0x40] sm:$0xff] %v1699_v33   ;;  %1839 = vst [vmem:[#allocation2 + $0xc0] sm:$0xff] %v1779_v34   ;;  %v895_v39 = vmul.f32 %v2287_v15, %v689_v37  ;;  %v927_v40 = vmul.f32 %v2287_v15, %v817_v38  ;;  %v1029_v45 = vmax.f32 %v965_v35, 0.0  ;;  %v1061_v46 = vmax.f32 %v997_v36, 0.0 }
 0x137   :  { %v691_v41 = vpop.f32.mrf.mxu0  ;;  %v819_v42 = vpop.f32.mrf.mxu1 }
 0x138   :  { %v966_v43 = vadd.f32 %v2293_v19, %v895_v39  ;;  %v998_v44 = vadd.f32 %v2293_v19, %v927_v40 }
 0x139   :  { %v694_v47 = vpop.f32.mrf.mxu0  ;;  %v822_v48 = vpop.f32.mrf.mxu1 }
 0x13a   :  { %v1030_v49 = vmax.f32 %v966_v43, 0.0  ;;  %v1062_v50 = vmax.f32 %v998_v44, 0.0  ;;  %v896_v51 = vmul.f32 %v2287_v15, %v694_v47  ;;  %v928_v52 = vmul.f32 %v2287_v15, %v822_v48 }
 0x13b   :  { %v696_v53 = vpop.f32.mrf.mxu0  ;;  %v824_v54 = vpop.f32.mrf.mxu1 }
 0x13c   :  { %v1704_v55 = vpack.c.bf16 %v1030_v49, %v1029_v45  ;;  %v1784_v56 = vpack.c.bf16 %v1062_v50, %v1061_v46  ;;  %v967_v57 = vadd.f32 %v2293_v19, %v896_v51  ;;  %v999_v58 = vadd.f32 %v2293_v19, %v928_v52 }
 0x13d   :  { %v697_v59 = vpop.f32.mrf.mxu0  ;;  %v825_v60 = vpop.f32.mrf.mxu1 }
 0x13e   :  { %1824 = vst [vmem:[#allocation2 + $0x48] sm:$0xff] %v1704_v55   ;;  %1840 = vst [vmem:[#allocation2 + $0xc8] sm:$0xff] %v1784_v56   ;;  %v897_v61 = vmul.f32 %v2287_v15, %v697_v59  ;;  %v929_v62 = vmul.f32 %v2287_v15, %v825_v60  ;;  %v1031_v3 = vmax.f32 %v967_v57, 0.0  ;;  %v1063_v4 = vmax.f32 %v999_v58, 0.0 }
 0x13f   :  { %v699_v63 = vpop.f32.mrf.mxu0  ;;  %v827_v0 = vpop.f32.mrf.mxu1 }
 0x140   :  { %v968_v1 = vadd.f32 %v2293_v19, %v897_v61  ;;  %v1000_v2 = vadd.f32 %v2293_v19, %v929_v62 }
 0x141   :  { %v702_v5 = vpop.f32.mrf.mxu0  ;;  %v830_v6 = vpop.f32.mrf.mxu1 }
 0x142   :  { %v1032_v7 = vmax.f32 %v968_v1, 0.0  ;;  %v1064_v8 = vmax.f32 %v1000_v2, 0.0  ;;  %v898_v9 = vmul.f32 %v2287_v15, %v702_v5  ;;  %v930_v10 = vmul.f32 %v2287_v15, %v830_v6 }
 0x143   :  { %v704_v11 = vpop.f32.mrf.mxu0  ;;  %v832_v12 = vpop.f32.mrf.mxu1 }
 0x144   :  { %v1709_v13 = vpack.c.bf16 %v1032_v7, %v1031_v3  ;;  %v1789_v14 = vpack.c.bf16 %v1064_v8, %v1063_v4  ;;  %v969_v16 = vadd.f32 %v2293_v19, %v898_v9  ;;  %v1001_v17 = vadd.f32 %v2293_v19, %v930_v10 }
 0x145   :  { %v705_v18 = vpop.f32.mrf.mxu0  ;;  %v833_v20 = vpop.f32.mrf.mxu1 }
 0x146   :  { %1825 = vst [vmem:[#allocation2 + $0x50] sm:$0xff] %v1709_v13   ;;  %1841 = vst [vmem:[#allocation2 + $0xd0] sm:$0xff] %v1789_v14   ;;  %v899_v21 = vmul.f32 %v2287_v15, %v705_v18  ;;  %v931_v22 = vmul.f32 %v2287_v15, %v833_v20  ;;  %v1033_v27 = vmax.f32 %v969_v16, 0.0  ;;  %v1065_v28 = vmax.f32 %v1001_v17, 0.0 }
 0x147   :  { %v707_v23 = vpop.f32.mrf.mxu0  ;;  %v835_v24 = vpop.f32.mrf.mxu1 }
 0x148   :  { %v970_v25 = vadd.f32 %v2293_v19, %v899_v21  ;;  %v1002_v26 = vadd.f32 %v2293_v19, %v931_v22 }
 0x149   :  { %v710_v29 = vpop.f32.mrf.mxu0  ;;  %v838_v30 = vpop.f32.mrf.mxu1 }
 0x14a   :  { %v1034_v31 = vmax.f32 %v970_v25, 0.0  ;;  %v1066_v32 = vmax.f32 %v1002_v26, 0.0  ;;  %v900_v33 = vmul.f32 %v2287_v15, %v710_v29  ;;  %v932_v34 = vmul.f32 %v2287_v15, %v838_v30 }
 0x14b   :  { %v712_v35 = vpop.f32.mrf.mxu0  ;;  %v840_v36 = vpop.f32.mrf.mxu1 }
 0x14c   :  { %v1714_v37 = vpack.c.bf16 %v1034_v31, %v1033_v27  ;;  %v1794_v38 = vpack.c.bf16 %v1066_v32, %v1065_v28  ;;  %v971_v39 = vadd.f32 %v2293_v19, %v900_v33  ;;  %v1003_v40 = vadd.f32 %v2293_v19, %v932_v34 }
 0x14d   :  { %v713_v41 = vpop.f32.mrf.mxu0  ;;  %v841_v42 = vpop.f32.mrf.mxu1 }
 0x14e   :  { %1826 = vst [vmem:[#allocation2 + $0x58] sm:$0xff] %v1714_v37   ;;  %1842 = vst [vmem:[#allocation2 + $0xd8] sm:$0xff] %v1794_v38   ;;  %v901_v43 = vmul.f32 %v2287_v15, %v713_v41  ;;  %v933_v44 = vmul.f32 %v2287_v15, %v841_v42  ;;  %v1035_v49 = vmax.f32 %v971_v39, 0.0  ;;  %v1067_v50 = vmax.f32 %v1003_v40, 0.0 }
 0x14f   :  { %v715_v45 = vpop.f32.mrf.mxu0  ;;  %v843_v46 = vpop.f32.mrf.mxu1 }
 0x150   :  { %v972_v47 = vadd.f32 %v2293_v19, %v901_v43  ;;  %v1004_v48 = vadd.f32 %v2293_v19, %v933_v44 }
 0x151   :  { %v718_v51 = vpop.f32.mrf.mxu0  ;;  %v846_v52 = vpop.f32.mrf.mxu1 }
 0x152   :  { %v1036_v53 = vmax.f32 %v972_v47, 0.0  ;;  %v1068_v54 = vmax.f32 %v1004_v48, 0.0  ;;  %v902_v55 = vmul.f32 %v2287_v15, %v718_v51  ;;  %v934_v56 = vmul.f32 %v2287_v15, %v846_v52 }
 0x153   :  { %v720_v57 = vpop.f32.mrf.mxu0  ;;  %v848_v58 = vpop.f32.mrf.mxu1 }
 0x154   :  { %v1719_v59 = vpack.c.bf16 %v1036_v53, %v1035_v49  ;;  %v1799_v60 = vpack.c.bf16 %v1068_v54, %v1067_v50  ;;  %v973_v61 = vadd.f32 %v2293_v19, %v902_v55  ;;  %v1005_v62 = vadd.f32 %v2293_v19, %v934_v56 }
 0x155   :  { %v721_v63 = vpop.f32.mrf.mxu0  ;;  %v849_v0 = vpop.f32.mrf.mxu1 }
 0x156   :  { %1827 = vst [vmem:[#allocation2 + $0x60] sm:$0xff] %v1719_v59   ;;  %1843 = vst [vmem:[#allocation2 + $0xe0] sm:$0xff] %v1799_v60   ;;  %v903_v1 = vmul.f32 %v2287_v15, %v721_v63  ;;  %v935_v2 = vmul.f32 %v2287_v15, %v849_v0  ;;  %v1037_v7 = vmax.f32 %v973_v61, 0.0  ;;  %v1069_v8 = vmax.f32 %v1005_v62, 0.0 }
 0x157   :  { %v723_v3 = vpop.f32.mrf.mxu0  ;;  %v851_v4 = vpop.f32.mrf.mxu1 }
 0x158   :  { %v974_v5 = vadd.f32 %v2293_v19, %v903_v1  ;;  %v1006_v6 = vadd.f32 %v2293_v19, %v935_v2 }
 0x159   :  { %v726_v9 = vpop.f32.mrf.mxu0  ;;  %v854_v10 = vpop.f32.mrf.mxu1 }
 0x15a   :  { %v1038_v11 = vmax.f32 %v974_v5, 0.0  ;;  %v1070_v12 = vmax.f32 %v1006_v6, 0.0  ;;  %v904_v13 = vmul.f32 %v2287_v15, %v726_v9  ;;  %v936_v14 = vmul.f32 %v2287_v15, %v854_v10 }
 0x15b   :  { %v728_v16 = vpop.f32.mrf.mxu0  ;;  %v856_v17 = vpop.f32.mrf.mxu1 }
 0x15c   :  { %v1724_v18 = vpack.c.bf16 %v1038_v11, %v1037_v7  ;;  %v1804_v20 = vpack.c.bf16 %v1070_v12, %v1069_v8  ;;  %v975_v21 = vadd.f32 %v2293_v19, %v904_v13  ;;  %v1007_v22 = vadd.f32 %v2293_v19, %v936_v14 }
 0x15d   :  { %v729_v23 = vpop.f32.mrf.mxu0  ;;  %v857_v24 = vpop.f32.mrf.mxu1 }
 0x15e   :  { %1828 = vst [vmem:[#allocation2 + $0x68] sm:$0xff] %v1724_v18   ;;  %1844 = vst [vmem:[#allocation2 + $0xe8] sm:$0xff] %v1804_v20   ;;  %v905_v25 = vmul.f32 %v2287_v15, %v729_v23  ;;  %v937_v26 = vmul.f32 %v2287_v15, %v857_v24  ;;  %v1039_v31 = vmax.f32 %v975_v21, 0.0  ;;  %v1071_v32 = vmax.f32 %v1007_v22, 0.0 }
 0x15f   :  { %v731_v27 = vpop.f32.mrf.mxu0  ;;  %v859_v28 = vpop.f32.mrf.mxu1 }
 0x160   :  { %v976_v29 = vadd.f32 %v2293_v19, %v905_v25  ;;  %v1008_v30 = vadd.f32 %v2293_v19, %v937_v26 }
 0x161   :  { %v734_v33 = vpop.f32.mrf.mxu0  ;;  %v862_v34 = vpop.f32.mrf.mxu1 }
 0x162   :  { %v1040_v35 = vmax.f32 %v976_v29, 0.0  ;;  %v1072_v36 = vmax.f32 %v1008_v30, 0.0  ;;  %v906_v37 = vmul.f32 %v2287_v15, %v734_v33  ;;  %v938_v38 = vmul.f32 %v2287_v15, %v862_v34 }
 0x163   :  { %v736_v39 = vpop.f32.mrf.mxu0  ;;  %v864_v40 = vpop.f32.mrf.mxu1 }
 0x164   :  { %v1729_v41 = vpack.c.bf16 %v1040_v35, %v1039_v31  ;;  %v1809_v42 = vpack.c.bf16 %v1072_v36, %v1071_v32  ;;  %v977_v45 = vadd.f32 %v2293_v19, %v906_v37  ;;  %v1009_v46 = vadd.f32 %v2293_v19, %v938_v38 }
 0x165   :  { %v737_v43 = vpop.f32.mrf.mxu0  ;;  %v865_v44 = vpop.f32.mrf.mxu1 }
 0x166   :  { %1829 = vst [vmem:[#allocation2 + $0x70] sm:$0xff] %v1729_v41   ;;  %1845 = vst [vmem:[#allocation2 + $0xf0] sm:$0xff] %v1809_v42   ;;  %v907_v47 = vmul.f32 %v2287_v15, %v737_v43  ;;  %v939_v48 = vmul.f32 %v2287_v15, %v865_v44  ;;  %v1041_v53 = vmax.f32 %v977_v45, 0.0  ;;  %v1073_v54 = vmax.f32 %v1009_v46, 0.0 }
 0x167   :  { %v739_v49 = vpop.f32.mrf.mxu0  ;;  %v867_v50 = vpop.f32.mrf.mxu1 }
 0x168   :  { %v978_v51 = vadd.f32 %v2293_v19, %v907_v47  ;;  %v1010_v52 = vadd.f32 %v2293_v19, %v939_v48 }
 0x16a   :  { %v1042_v55 = vmax.f32 %v978_v51, 0.0  ;;  %v1074_v56 = vmax.f32 %v1010_v52, 0.0 }
 0x16c   :  { %v1734_v57 = vpack.c.bf16 %v1042_v55, %v1041_v53  ;;  %v1814_v58 = vpack.c.bf16 %v1074_v56, %v1073_v54 }
 0x16e   :  { %1830 = vst [vmem:[#allocation2 + $0x78] sm:$0xff] %v1734_v57   ;;  %1846 = vst [vmem:[#allocation2 + $0xf8] sm:$0xff] %v1814_v58  }
 0x16f   :  { %1989 = shalt.err (!%p1986_p4)
}
 0x170   :  { %s2003_s6 = smov 64   ;;  %s2004_s7 = smov 4  }
 0x171   :  { %1409 = dma.vmem_to_hbm [thread:$0]  %s1404_s2, 4096, %s2429_s4, [#allocation3], %s2003_s6, %s2003_s6, %s2004_s7  }
 0x172   :  { %1998 = dma.done.wait [#allocation3], 4096  }
 0x173   :  { %1999 = vsyncadd [#allocation3], 4294963200 }
 0x174   :  { %1413 = vsyncpa [#allocation3], 1 }

</bundles_post_ra>
